<compile_context>
chip_gen: v5e
topology: v5e:2x2
jax: 0.10.0
libtpu: 0.0.40
codegen_flags: <defaults>
</compile_context>

<pallas_src>
import functools

import jax
import jax.numpy as jnp
from jax.experimental import pallas as pl
from jax.experimental.pallas import tpu as pltpu


# ----------------------------------------------------------------------------
# Fused Pallas kernel: one grid step == one batch element, everything in VMEM.
# ----------------------------------------------------------------------------
def _mae_fused_kernel(compute_loss, *refs):
    if compute_loss:
        (patches_ref, pu_ref, pm_ref, pos_ref,
         pw_ref, pb_ref, mt_ref,
         ew1_ref, eb1_ref, ew2_ref, eb2_ref,
         dw1_ref, db1_ref, dw2_ref, db2_ref,
         ow_ref, ob_ref,
         dec_ref, sse_ref, dec_scratch) = refs
    else:
        (patches_ref, pu_ref, pm_ref, pos_ref,
         pw_ref, pb_ref, mt_ref,
         ew1_ref, eb1_ref, ew2_ref, eb2_ref,
         dw1_ref, db1_ref, dw2_ref, db2_ref,
         dec_ref, dec_scratch) = refs
        ow_ref = ob_ref = sse_ref = None

    f32 = jnp.float32
    bf16 = jnp.bfloat16

    patches = patches_ref[0]          # (N, PD) f32
    pu = pu_ref[0]                    # (Nu, N) f32 one-hot row selector (unmasked)
    pm = pm_ref[0]                    # (Nm, N) f32 one-hot row selector (masked)
    pos = pos_ref[...]                # (N, D)  f32
    Nu = pu.shape[0]
    N = patches.shape[0]

    # ---- gathers as exact one-hot matmuls on the MXU (no HBM gather copies) ----
    u_patch = jnp.dot(pu, patches, preferred_element_type=f32)   # (Nu, PD)
    u_pos = jnp.dot(pu, pos, preferred_element_type=f32)         # (Nu, D)
    m_pos = jnp.dot(pm, pos, preferred_element_type=f32)         # (Nm, D)

    # ---- patch_encoder: project only the unmasked rows; mask token projected once ----
    pw = pw_ref[...]                                             # (PD, D) bf16
    pb = pb_ref[...]                                             # (1, D)  f32
    u_emb = jnp.dot(u_patch.astype(bf16), pw, preferred_element_type=f32) + pb + u_pos
    mask_emb = jnp.dot(mt_ref[...], pw, preferred_element_type=f32) + pb   # (1, D)
    m_emb = mask_emb + m_pos                                      # (Nm, D)

    # ---- encoder MLP on unmasked rows (bf16 matmul, fp32 epilogue) ----
    h = jnp.dot(u_emb.astype(bf16), ew1_ref[...], preferred_element_type=f32) + eb1_ref[...]
    h = jax.nn.gelu(h)
    enc = jnp.dot(h.astype(bf16), ew2_ref[...], preferred_element_type=f32) + eb2_ref[...]
    enc = enc + u_pos                                             # encoder_outputs + unmasked_positions

    # ---- decoder input = concat([enc, m_emb], axis=0), built in VMEM scratch ----
    dec_scratch[0:Nu, :] = enc
    dec_scratch[Nu:N, :] = m_emb
    dec_in = dec_scratch[...]                                     # (N, D)

    # ---- decoder MLP ----
    h2 = jnp.dot(dec_in.astype(bf16), dw1_ref[...], preferred_element_type=f32) + db1_ref[...]
    h2 = jax.nn.gelu(h2)
    dec = jnp.dot(h2.astype(bf16), dw2_ref[...], preferred_element_type=f32) + db2_ref[...]  # (N, D)

    dec_ref[0] = dec.astype(dec_ref.dtype)

    if compute_loss:
        # patch_layer2 on masked rows only + per-batch sum of squared error
        m_tgt = jnp.dot(pm, patches, preferred_element_type=f32)            # (Nm, PD)
        m_dec = jnp.dot(pm, dec, preferred_element_type=f32)                # (Nm, D)
        m_pred = (jnp.dot(m_dec.astype(bf16), ow_ref[...], preferred_element_type=f32)
                  + ob_ref[...])                                            # (Nm, PD)
        diff = m_tgt - m_pred
        sse_ref[...] = jnp.sum(diff * diff).reshape(1, 1, 1)


def _mae_fused_call(patches, pu, pm, params, *, compute_loss):
    B, N, PD = patches.shape
    Nu = pu.shape[1]
    Nm = pm.shape[1]
    D = params["proj_w"].shape[1]
    Hm = params["enc_w1"].shape[1]
    f32, bf16 = jnp.float32, jnp.bfloat16

    # bf16 matmul operands (halves weight DMA, full-rate MXU); biases / pos table stay f32.
    pw = params["proj_w"].astype(bf16)
    mt = params["mask_token"].astype(bf16)                       # (1, PD)
    ew1 = params["enc_w1"].astype(bf16)
    ew2 = params["enc_w2"].astype(bf16)
    dw1 = params["dec_w1"].astype(bf16)
    dw2 = params["dec_w2"].astype(bf16)
    pb = params["proj_b"].reshape(1, D)
    eb1 = params["enc_b1"].reshape(1, Hm)
    eb2 = params["enc_b2"].reshape(1, D)
    db1 = params["dec_b1"].reshape(1, Hm)
    db2 = params["dec_b2"].reshape(1, D)

    def const2d(shape):
        return pl.BlockSpec(shape, lambda b: (0, 0))

    inputs = [patches, pu, pm, params["pos_emb"], pw, pb, mt,
              ew1, eb1, ew2, eb2, dw1, db1, dw2, db2]
    in_specs = [
        pl.BlockSpec((1, N, PD), lambda b: (b, 0, 0)),
        pl.BlockSpec((1, Nu, N), lambda b: (b, 0, 0)),
        pl.BlockSpec((1, Nm, N), lambda b: (b, 0, 0)),
        const2d((N, D)),
        const2d((PD, D)), const2d((1, D)), const2d((1, PD)),
        const2d((D, Hm)), const2d((1, Hm)), const2d((Hm, D)), const2d((1, D)),
        const2d((D, Hm)), const2d((1, Hm)), const2d((Hm, D)), const2d((1, D)),
    ]
    out_shape = [jax.ShapeDtypeStruct((B, N, D), f32)]
    out_specs = [pl.BlockSpec((1, N, D), lambda b: (b, 0, 0))]
    if compute_loss:
        inputs += [params["out_w"].astype(bf16), params["out_b"].reshape(1, PD)]
        in_specs += [const2d((D, PD)), const2d((1, PD))]
        out_shape.append(jax.ShapeDtypeStruct((B, 1, 1), f32))
        out_specs.append(pl.BlockSpec((1, 1, 1), lambda b: (b, 0, 0)))

    # Note (v7x scaling): constant-index weight blocks could be single-buffered via
    # pipeline_mode=pl.Buffered(1) and vmem_limit_bytes set explicitly once D/Hm grow;
    # at these sizes the weight set is a few KB so defaults are ample.
    results = pl.pallas_call(
        functools.partial(_mae_fused_kernel, compute_loss),
        out_shape=tuple(out_shape),
        grid_spec=pltpu.PrefetchScalarGridSpec(
            num_scalar_prefetch=0,
            grid=(B,),                               # >= 2-way parallel axis (v7x megacore)
            in_specs=in_specs,
            out_specs=tuple(out_specs),
            scratch_shapes=[pltpu.VMEM((N, D), f32)],
        ),
        compiler_params=pltpu.CompilerParams(
            dimension_semantics=("parallel",),
        ),
    )(*inputs)
    if compute_loss:
        dec, sse = results
        return dec, sse
    (dec,) = results
    return dec


# ----------------------------------------------------------------------------
# Plain-JAX glue (layout only) + full forward pass
# ----------------------------------------------------------------------------
def extract_patches(images, P):
    """patch_layer: NCHW image -> [B, N, C*P*P] flattened non-overlapping patches."""
    B, C, H, W = images.shape
    x = images.reshape(B, C, H // P, P, W // P, P)
    x = x.transpose(0, 2, 4, 1, 3, 5)  # [B, H/P, W/P, C, P, P]
    return x.reshape(B, (H // P) * (W // P), C * P * P)


def decoder_out_forward(images, params, mask_indices, unmask_indices, *, P=4,
                        compute_loss=False):
    patches = extract_patches(images, P)                 # [B, N, PD]
    B, N, PD = patches.shape
    # One-hot row-selection matrices (exact in f32); the gathers themselves run on the MXU
    # inside the fused kernel, so no gathered activation copies hit HBM.
    pu = jax.nn.one_hot(unmask_indices, N, dtype=jnp.float32)   # [B, Nu, N]
    pm = jax.nn.one_hot(mask_indices, N, dtype=jnp.float32)     # [B, Nm, N]

    if compute_loss:
        dec, sse = _mae_fused_call(patches, pu, pm, params, compute_loss=True)
        Nm = mask_indices.shape[1]
        total_loss = jnp.sum(sse) / (B * Nm * PD)        # nn.MSELoss (mean over masked patches)
        return dec, total_loss
    # forward() returns decoder_outputs only; the discarded loss path is skipped entirely.
    return _mae_fused_call(patches, pu, pm, params, compute_loss=False)


def init_params(key, patch_dim, D, H_mlp, N):
    ks = jax.random.split(key, 8)
    n = lambda k, shape: 0.02 * jax.random.normal(k, shape, jnp.float32)
    return {
        "proj_w": n(ks[0], (patch_dim, D)),
        "proj_b": jnp.zeros((D,), jnp.float32),
        "pos_emb": n(ks[1], (N, D)),
        "mask_token": n(ks[2], (1, patch_dim)),
        "enc_w1": n(ks[3], (D, H_mlp)),
        "enc_b1": jnp.zeros((H_mlp,), jnp.float32),
        "enc_w2": n(ks[4], (H_mlp, D)),
        "enc_b2": jnp.zeros((D,), jnp.float32),
        "dec_w1": n(ks[5], (D, H_mlp)),
        "dec_b1": jnp.zeros((H_mlp,), jnp.float32),
        "dec_w2": n(ks[6], (H_mlp, D)),
        "dec_b2": jnp.zeros((D,), jnp.float32),
        "out_w": n(ks[7], (D, patch_dim)),
        "out_b": jnp.zeros((patch_dim,), jnp.float32),
    }


if __name__ == "__main__":
    B, C, Himg, Wimg, P = 2, 4, 16, 16, 4
    D, H_mlp = 32, 64
    N = (Himg // P) * (Wimg // P)        # 16 patches
    Nm = N // 2                          # 50% masking ratio
    patch_dim = C * P * P                # 64

    key = jax.random.PRNGKey(0)
    kimg, kperm, kparams = jax.random.split(key, 3)

    images = jax.random.normal(kimg, (B, C, Himg, Wimg), jnp.float32)
    # deterministic per-batch mask / unmask index permutations
    perm = jnp.stack(
        [jax.random.permutation(jax.random.fold_in(kperm, b), N) for b in range(B)]
    ).astype(jnp.int32)
    mask_indices = perm[:, :Nm]          # [B, Nm]
    unmask_indices = perm[:, Nm:]        # [B, N - Nm]

    params = init_params(kparams, patch_dim, D, H_mlp, N)

    fwd = jax.jit(functools.partial(decoder_out_forward, P=P, compute_loss=False))
    out = fwd(images, params, mask_indices, unmask_indices)
    jax.block_until_ready(out)
    assert out.shape == (B, N, D)
    print("KERNEL_OK")
</pallas_src>

<mosaic_0001>
module attributes {stable_mosaic.version = 11 : i64} {
  func.func @_mae_fused_kernel(%arg0: i32, %arg1: memref<1x16x64xf32, #tpu.memory_space<vmem>>, %arg2: memref<1x8x16xf32, #tpu.memory_space<vmem>>, %arg3: memref<1x8x16xf32, #tpu.memory_space<vmem>>, %arg4: memref<16x32xf32, #tpu.memory_space<vmem>>, %arg5: memref<64x32xbf16, #tpu.memory_space<vmem>>, %arg6: memref<1x32xf32, #tpu.memory_space<vmem>>, %arg7: memref<1x64xbf16, #tpu.memory_space<vmem>>, %arg8: memref<32x64xbf16, #tpu.memory_space<vmem>>, %arg9: memref<1x64xf32, #tpu.memory_space<vmem>>, %arg10: memref<64x32xbf16, #tpu.memory_space<vmem>>, %arg11: memref<1x32xf32, #tpu.memory_space<vmem>>, %arg12: memref<32x64xbf16, #tpu.memory_space<vmem>>, %arg13: memref<1x64xf32, #tpu.memory_space<vmem>>, %arg14: memref<64x32xbf16, #tpu.memory_space<vmem>>, %arg15: memref<1x32xf32, #tpu.memory_space<vmem>>, %arg16: memref<1x16x32xf32, #tpu.memory_space<vmem>>, %arg17: memref<16x32xf32, #tpu.memory_space<vmem>>) attributes {dimension_semantics = [#tpu.dimension_semantics<parallel>], iteration_bounds = array<i64: 2>, scalar_prefetch = 0 : i64, scratch_operands = 1 : i64, tpu.core_type = #tpu.core_type<tc>, window_params = [{transform_indices = @transform_0, window_bounds = array<i64: 1, 16, 64>}, {transform_indices = @transform_1, window_bounds = array<i64: 1, 8, 16>}, {transform_indices = @transform_2, window_bounds = array<i64: 1, 8, 16>}, {pipeline_mode = #tpu.pipeline_mode<synchronous>, transform_indices = @transform_3, window_bounds = array<i64: 16, 32>}, {pipeline_mode = #tpu.pipeline_mode<synchronous>, transform_indices = @transform_4, window_bounds = array<i64: 64, 32>}, {pipeline_mode = #tpu.pipeline_mode<synchronous>, transform_indices = @transform_5, window_bounds = array<i64: 1, 32>}, {pipeline_mode = #tpu.pipeline_mode<synchronous>, transform_indices = @transform_6, window_bounds = array<i64: 1, 64>}, {pipeline_mode = #tpu.pipeline_mode<synchronous>, transform_indices = @transform_7, window_bounds = array<i64: 32, 64>}, {pipeline_mode = #tpu.pipeline_mode<synchronous>, transform_indices = @transform_8, window_bounds = array<i64: 1, 64>}, {pipeline_mode = #tpu.pipeline_mode<synchronous>, transform_indices = @transform_9, window_bounds = array<i64: 64, 32>}, {pipeline_mode = #tpu.pipeline_mode<synchronous>, transform_indices = @transform_10, window_bounds = array<i64: 1, 32>}, {pipeline_mode = #tpu.pipeline_mode<synchronous>, transform_indices = @transform_11, window_bounds = array<i64: 32, 64>}, {pipeline_mode = #tpu.pipeline_mode<synchronous>, transform_indices = @transform_12, window_bounds = array<i64: 1, 64>}, {pipeline_mode = #tpu.pipeline_mode<synchronous>, transform_indices = @transform_13, window_bounds = array<i64: 64, 32>}, {pipeline_mode = #tpu.pipeline_mode<synchronous>, transform_indices = @transform_14, window_bounds = array<i64: 1, 32>}, {transform_indices = @transform_15, window_bounds = array<i64: 1, 16, 32>}]} {
    %c0 = arith.constant 0 : index
    %c0_0 = arith.constant 0 : index
    %c0_1 = arith.constant 0 : index
    %0 = vector.load %arg1[%c0, %c0_0, %c0_1] : memref<1x16x64xf32, #tpu.memory_space<vmem>>, vector<1x16x64xf32>
    %1 = vector.shape_cast %0 : vector<1x16x64xf32> to vector<16x64xf32>
    %c0_2 = arith.constant 0 : index
    %c0_3 = arith.constant 0 : index
    %c0_4 = arith.constant 0 : index
    %2 = vector.load %arg2[%c0_2, %c0_3, %c0_4] : memref<1x8x16xf32, #tpu.memory_space<vmem>>, vector<1x8x16xf32>
    %3 = vector.shape_cast %2 : vector<1x8x16xf32> to vector<8x16xf32>
    %c0_5 = arith.constant 0 : index
    %c0_6 = arith.constant 0 : index
    %c0_7 = arith.constant 0 : index
    %4 = vector.load %arg3[%c0_5, %c0_6, %c0_7] : memref<1x8x16xf32, #tpu.memory_space<vmem>>, vector<1x8x16xf32>
    %5 = vector.shape_cast %4 : vector<1x8x16xf32> to vector<8x16xf32>
    %c0_8 = arith.constant 0 : index
    %c0_9 = arith.constant 0 : index
    %6 = vector.load %arg4[%c0_8, %c0_9] : memref<16x32xf32, #tpu.memory_space<vmem>>, vector<16x32xf32>
    %cst = arith.constant dense<0.000000e+00> : vector<8x64xf32>
    %7 = tpu.matmul %3, %1, %cst {dimension_numbers = #tpu.dot_dimension_numbers<[1], [0], [0], [1], [0, 0, 1, 1], [], []>} : vector<8x16xf32>, vector<16x64xf32>, vector<8x64xf32> -> vector<8x64xf32>
    %cst_10 = arith.constant dense<0.000000e+00> : vector<8x32xf32>
    %8 = tpu.matmul %3, %6, %cst_10 {dimension_numbers = #tpu.dot_dimension_numbers<[1], [0], [0], [1], [0, 0, 1, 1], [], []>} : vector<8x16xf32>, vector<16x32xf32>, vector<8x32xf32> -> vector<8x32xf32>
    %cst_11 = arith.constant dense<0.000000e+00> : vector<8x32xf32>
    %9 = tpu.matmul %5, %6, %cst_11 {dimension_numbers = #tpu.dot_dimension_numbers<[1], [0], [0], [1], [0, 0, 1, 1], [], []>} : vector<8x16xf32>, vector<16x32xf32>, vector<8x32xf32> -> vector<8x32xf32>
    %c0_12 = arith.constant 0 : index
    %c0_13 = arith.constant 0 : index
    %10 = vector.load %arg5[%c0_12, %c0_13] : memref<64x32xbf16, #tpu.memory_space<vmem>>, vector<64x32xbf16>
    %c0_14 = arith.constant 0 : index
    %c0_15 = arith.constant 0 : index
    %11 = vector.load %arg6[%c0_14, %c0_15] : memref<1x32xf32, #tpu.memory_space<vmem>>, vector<1x32xf32>
    %12 = arith.truncf %7 : vector<8x64xf32> to vector<8x64xbf16>
    %cst_16 = arith.constant dense<0.000000e+00> : vector<8x32xf32>
    %13 = tpu.matmul %12, %10, %cst_16 {dimension_numbers = #tpu.dot_dimension_numbers<[1], [0], [0], [1], [0, 0, 1, 1], [], []>} : vector<8x64xbf16>, vector<64x32xbf16>, vector<8x32xf32> -> vector<8x32xf32>
    %14 = vector.broadcast %11 : vector<1x32xf32> to vector<8x32xf32>
    %15 = arith.addf %13, %14 : vector<8x32xf32>
    %16 = arith.addf %15, %8 : vector<8x32xf32>
    %c0_17 = arith.constant 0 : index
    %c0_18 = arith.constant 0 : index
    %17 = vector.load %arg7[%c0_17, %c0_18] : memref<1x64xbf16, #tpu.memory_space<vmem>>, vector<1x64xbf16>
    %cst_19 = arith.constant dense<0.000000e+00> : vector<1x32xf32>
    %18 = tpu.matmul %17, %10, %cst_19 {dimension_numbers = #tpu.dot_dimension_numbers<[1], [0], [0], [1], [0, 0, 1, 1], [], []>} : vector<1x64xbf16>, vector<64x32xbf16>, vector<1x32xf32> -> vector<1x32xf32>
    %19 = arith.addf %18, %11 : vector<1x32xf32>
    %20 = vector.broadcast %19 : vector<1x32xf32> to vector<8x32xf32>
    %21 = arith.addf %20, %9 : vector<8x32xf32>
    %22 = arith.truncf %16 : vector<8x32xf32> to vector<8x32xbf16>
    %c0_20 = arith.constant 0 : index
    %c0_21 = arith.constant 0 : index
    %23 = vector.load %arg8[%c0_20, %c0_21] : memref<32x64xbf16, #tpu.memory_space<vmem>>, vector<32x64xbf16>
    %cst_22 = arith.constant dense<0.000000e+00> : vector<8x64xf32>
    %24 = tpu.matmul %22, %23, %cst_22 {dimension_numbers = #tpu.dot_dimension_numbers<[1], [0], [0], [1], [0, 0, 1, 1], [], []>} : vector<8x32xbf16>, vector<32x64xbf16>, vector<8x64xf32> -> vector<8x64xf32>
    %c0_23 = arith.constant 0 : index
    %c0_24 = arith.constant 0 : index
    %25 = vector.load %arg9[%c0_23, %c0_24] : memref<1x64xf32, #tpu.memory_space<vmem>>, vector<1x64xf32>
    %26 = vector.broadcast %25 : vector<1x64xf32> to vector<8x64xf32>
    %27 = arith.addf %24, %26 : vector<8x64xf32>
    %28 = arith.mulf %27, %27 : vector<8x64xf32>
    %29 = arith.mulf %27, %28 : vector<8x64xf32>
    %cst_25 = arith.constant 4.471500e-02 : f32
    %30 = vector.broadcast %cst_25 : f32 to vector<8x64xf32>
    %31 = arith.mulf %30, %29 : vector<8x64xf32>
    %32 = arith.addf %27, %31 : vector<8x64xf32>
    %cst_26 = arith.constant 0.797884583 : f32
    %33 = vector.broadcast %cst_26 : f32 to vector<8x64xf32>
    %34 = arith.mulf %33, %32 : vector<8x64xf32>
    %35 = math.tanh %34 : vector<8x64xf32>
    %cst_27 = arith.constant 1.000000e+00 : f32
    %36 = vector.broadcast %cst_27 : f32 to vector<8x64xf32>
    %37 = arith.addf %36, %35 : vector<8x64xf32>
    %cst_28 = arith.constant 5.000000e-01 : f32
    %38 = vector.broadcast %cst_28 : f32 to vector<8x64xf32>
    %39 = arith.mulf %38, %37 : vector<8x64xf32>
    %40 = arith.mulf %27, %39 : vector<8x64xf32>
    %41 = arith.truncf %40 : vector<8x64xf32> to vector<8x64xbf16>
    %c0_29 = arith.constant 0 : index
    %c0_30 = arith.constant 0 : index
    %42 = vector.load %arg10[%c0_29, %c0_30] : memref<64x32xbf16, #tpu.memory_space<vmem>>, vector<64x32xbf16>
    %cst_31 = arith.constant dense<0.000000e+00> : vector<8x32xf32>
    %43 = tpu.matmul %41, %42, %cst_31 {dimension_numbers = #tpu.dot_dimension_numbers<[1], [0], [0], [1], [0, 0, 1, 1], [], []>} : vector<8x64xbf16>, vector<64x32xbf16>, vector<8x32xf32> -> vector<8x32xf32>
    %c0_32 = arith.constant 0 : index
    %c0_33 = arith.constant 0 : index
    %44 = vector.load %arg11[%c0_32, %c0_33] : memref<1x32xf32, #tpu.memory_space<vmem>>, vector<1x32xf32>
    %45 = vector.broadcast %44 : vector<1x32xf32> to vector<8x32xf32>
    %46 = arith.addf %43, %45 : vector<8x32xf32>
    %47 = arith.addf %46, %8 : vector<8x32xf32>
    %c0_34 = arith.constant 0 : index
    %c0_35 = arith.constant 0 : index
    %48 = vector.load %arg17[%c0_34, %c0_35] : memref<16x32xf32, #tpu.memory_space<vmem>>, vector<8x32xf32>
    tpu.vector_store %arg17[%c0_34, %c0_35], %47 {strides = array<i32>} : memref<16x32xf32, #tpu.memory_space<vmem>>, vector<8x32xf32>,
    %c8 = arith.constant 8 : index
    %c0_36 = arith.constant 0 : index
    %49 = vector.load %arg17[%c8, %c0_36] : memref<16x32xf32, #tpu.memory_space<vmem>>, vector<8x32xf32>
    tpu.vector_store %arg17[%c8, %c0_36], %21 {strides = array<i32>} : memref<16x32xf32, #tpu.memory_space<vmem>>, vector<8x32xf32>,
    %c0_37 = arith.constant 0 : index
    %c0_38 = arith.constant 0 : index
    %50 = vector.load %arg17[%c0_37, %c0_38] : memref<16x32xf32, #tpu.memory_space<vmem>>, vector<16x32xf32>
    %51 = arith.truncf %50 : vector<16x32xf32> to vector<16x32xbf16>
    %c0_39 = arith.constant 0 : index
    %c0_40 = arith.constant 0 : index
    %52 = vector.load %arg12[%c0_39, %c0_40] : memref<32x64xbf16, #tpu.memory_space<vmem>>, vector<32x64xbf16>
    %cst_41 = arith.constant dense<0.000000e+00> : vector<16x64xf32>
    %53 = tpu.matmul %51, %52, %cst_41 {dimension_numbers = #tpu.dot_dimension_numbers<[1], [0], [0], [1], [0, 0, 1, 1], [], []>} : vector<16x32xbf16>, vector<32x64xbf16>, vector<16x64xf32> -> vector<16x64xf32>
    %c0_42 = arith.constant 0 : index
    %c0_43 = arith.constant 0 : index
    %54 = vector.load %arg13[%c0_42, %c0_43] : memref<1x64xf32, #tpu.memory_space<vmem>>, vector<1x64xf32>
    %55 = vector.broadcast %54 : vector<1x64xf32> to vector<16x64xf32>
    %56 = arith.addf %53, %55 : vector<16x64xf32>
    %57 = arith.mulf %56, %56 : vector<16x64xf32>
    %58 = arith.mulf %56, %57 : vector<16x64xf32>
    %cst_44 = arith.constant 4.471500e-02 : f32
    %59 = vector.broadcast %cst_44 : f32 to vector<16x64xf32>
    %60 = arith.mulf %59, %58 : vector<16x64xf32>
    %61 = arith.addf %56, %60 : vector<16x64xf32>
    %cst_45 = arith.constant 0.797884583 : f32
    %62 = vector.broadcast %cst_45 : f32 to vector<16x64xf32>
    %63 = arith.mulf %62, %61 : vector<16x64xf32>
    %64 = math.tanh %63 : vector<16x64xf32>
    %cst_46 = arith.constant 1.000000e+00 : f32
    %65 = vector.broadcast %cst_46 : f32 to vector<16x64xf32>
    %66 = arith.addf %65, %64 : vector<16x64xf32>
    %cst_47 = arith.constant 5.000000e-01 : f32
    %67 = vector.broadcast %cst_47 : f32 to vector<16x64xf32>
    %68 = arith.mulf %67, %66 : vector<16x64xf32>
    %69 = arith.mulf %56, %68 : vector<16x64xf32>
    %70 = arith.truncf %69 : vector<16x64xf32> to vector<16x64xbf16>
    %c0_48 = arith.constant 0 : index
    %c0_49 = arith.constant 0 : index
    %71 = vector.load %arg14[%c0_48, %c0_49] : memref<64x32xbf16, #tpu.memory_space<vmem>>, vector<64x32xbf16>
    %cst_50 = arith.constant dense<0.000000e+00> : vector<16x32xf32>
    %72 = tpu.matmul %70, %71, %cst_50 {dimension_numbers = #tpu.dot_dimension_numbers<[1], [0], [0], [1], [0, 0, 1, 1], [], []>} : vector<16x64xbf16>, vector<64x32xbf16>, vector<16x32xf32> -> vector<16x32xf32>
    %c0_51 = arith.constant 0 : index
    %c0_52 = arith.constant 0 : index
    %73 = vector.load %arg15[%c0_51, %c0_52] : memref<1x32xf32, #tpu.memory_space<vmem>>, vector<1x32xf32>
    %74 = vector.broadcast %73 : vector<1x32xf32> to vector<16x32xf32>
    %75 = arith.addf %72, %74 : vector<16x32xf32>
    %c0_53 = arith.constant 0 : index
    %c0_54 = arith.constant 0 : index
    %c0_55 = arith.constant 0 : index
    %76 = vector.load %arg16[%c0_53, %c0_54, %c0_55] : memref<1x16x32xf32, #tpu.memory_space<vmem>>, vector<1x16x32xf32>
    %77 = vector.shape_cast %76 : vector<1x16x32xf32> to vector<16x32xf32>
    %78 = vector.shape_cast %75 : vector<16x32xf32> to vector<1x16x32xf32>
    tpu.vector_store %arg16[%c0_53, %c0_54, %c0_55], %78 {strides = array<i32>} : memref<1x16x32xf32, #tpu.memory_space<vmem>>, vector<1x16x32xf32>,
    return
  }
  func.func @transform_0(%arg0: i32) -> (i32, i32, i32) {
    %c0_i32 = arith.constant 0 : i32
    %c0_i32_0 = arith.constant 0 : i32
    %c0_i32_1 = arith.constant 0 : i32
    return %arg0, %c0_i32, %c0_i32_0 : i32, i32, i32
  }
  func.func @transform_1(%arg0: i32) -> (i32, i32, i32) {
    %c0_i32 = arith.constant 0 : i32
    %c0_i32_0 = arith.constant 0 : i32
    %c0_i32_1 = arith.constant 0 : i32
    return %arg0, %c0_i32, %c0_i32_0 : i32, i32, i32
  }
  func.func @transform_2(%arg0: i32) -> (i32, i32, i32) {
    %c0_i32 = arith.constant 0 : i32
    %c0_i32_0 = arith.constant 0 : i32
    %c0_i32_1 = arith.constant 0 : i32
    return %arg0, %c0_i32, %c0_i32_0 : i32, i32, i32
  }
  func.func @transform_3(%arg0: i32) -> (i32, i32) {
    %c0_i32 = arith.constant 0 : i32
    %c0_i32_0 = arith.constant 0 : i32
    %c0_i32_1 = arith.constant 0 : i32
    return %c0_i32, %c0_i32_0 : i32, i32
  }
  func.func @transform_4(%arg0: i32) -> (i32, i32) {
    %c0_i32 = arith.constant 0 : i32
    %c0_i32_0 = arith.constant 0 : i32
    %c0_i32_1 = arith.constant 0 : i32
    return %c0_i32, %c0_i32_0 : i32, i32
  }
  func.func @transform_5(%arg0: i32) -> (i32, i32) {
    %c0_i32 = arith.constant 0 : i32
    %c0_i32_0 = arith.constant 0 : i32
    %c0_i32_1 = arith.constant 0 : i32
    return %c0_i32, %c0_i32_0 : i32, i32
  }
  func.func @transform_6(%arg0: i32) -> (i32, i32) {
    %c0_i32 = arith.constant 0 : i32
    %c0_i32_0 = arith.constant 0 : i32
    %c0_i32_1 = arith.constant 0 : i32
    return %c0_i32, %c0_i32_0 : i32, i32
  }
  func.func @transform_7(%arg0: i32) -> (i32, i32) {
    %c0_i32 = arith.constant 0 : i32
    %c0_i32_0 = arith.constant 0 : i32
    %c0_i32_1 = arith.constant 0 : i32
    return %c0_i32, %c0_i32_0 : i32, i32
  }
  func.func @transform_8(%arg0: i32) -> (i32, i32) {
    %c0_i32 = arith.constant 0 : i32
    %c0_i32_0 = arith.constant 0 : i32
    %c0_i32_1 = arith.constant 0 : i32
    return %c0_i32, %c0_i32_0 : i32, i32
  }
  func.func @transform_9(%arg0: i32) -> (i32, i32) {
    %c0_i32 = arith.constant 0 : i32
    %c0_i32_0 = arith.constant 0 : i32
    %c0_i32_1 = arith.constant 0 : i32
    return %c0_i32, %c0_i32_0 : i32, i32
  }
  func.func @transform_10(%arg0: i32) -> (i32, i32) {
    %c0_i32 = arith.constant 0 : i32
    %c0_i32_0 = arith.constant 0 : i32
    %c0_i32_1 = arith.constant 0 : i32
    return %c0_i32, %c0_i32_0 : i32, i32
  }
  func.func @transform_11(%arg0: i32) -> (i32, i32) {
    %c0_i32 = arith.constant 0 : i32
    %c0_i32_0 = arith.constant 0 : i32
    %c0_i32_1 = arith.constant 0 : i32
    return %c0_i32, %c0_i32_0 : i32, i32
  }
  func.func @transform_12(%arg0: i32) -> (i32, i32) {
    %c0_i32 = arith.constant 0 : i32
    %c0_i32_0 = arith.constant 0 : i32
    %c0_i32_1 = arith.constant 0 : i32
    return %c0_i32, %c0_i32_0 : i32, i32
  }
  func.func @transform_13(%arg0: i32) -> (i32, i32) {
    %c0_i32 = arith.constant 0 : i32
    %c0_i32_0 = arith.constant 0 : i32
    %c0_i32_1 = arith.constant 0 : i32
    return %c0_i32, %c0_i32_0 : i32, i32
  }
  func.func @transform_14(%arg0: i32) -> (i32, i32) {
    %c0_i32 = arith.constant 0 : i32
    %c0_i32_0 = arith.constant 0 : i32
    %c0_i32_1 = arith.constant 0 : i32
    return %c0_i32, %c0_i32_0 : i32, i32
  }
  func.func @transform_15(%arg0: i32) -> (i32, i32, i32) {
    %c0_i32 = arith.constant 0 : i32
    %c0_i32_0 = arith.constant 0 : i32
    %c0_i32_1 = arith.constant 0 : i32
    return %arg0, %c0_i32, %c0_i32_0 : i32, i32, i32
  }
}

</mosaic_0001>

<bundles_post_ra>
// kernel: decoder_out_forward.1
= control target key start
LH: loop header
LB: loop body
LE: loop exit
PB: predicated region body
PF: predicated region fallthrough
CT: control target
= control target key end

     0   :  { %s1484_s0 = inlined_call_operand.vmem [shape: f32[2,16,64], index: 0, kind: input, shape index: {}]   ;;  %s1485_s1 = inlined_call_operand.vmem [shape: f32[2,8,16], index: 1, kind: input, shape index: {}]   ;;  %s1486_s2 = inlined_call_operand.vmem [shape: f32[2,8,16], index: 2, kind: input, shape index: {}]   ;;  %s1487_s3 = inlined_call_operand.vmem [shape: f32[16,32], index: 3, kind: input, shape index: {}]   ;;  %s1488_s4 = inlined_call_operand.vmem [shape: bf16[64,32], index: 4, kind: input, shape index: {}]   ;;  %s1489_s5 = inlined_call_operand.vmem [shape: f32[1,32], index: 5, kind: input, shape index: {}]   ;;  %s1490_s6 = inlined_call_operand.vmem [shape: bf16[1,64], index: 6, kind: input, shape index: {}]   ;;  %s1491_s7 = inlined_call_operand.vmem [shape: bf16[32,64], index: 7, kind: input, shape index: {}]   ;;  %s1492_s8 = inlined_call_operand.vmem [shape: f32[1,64], index: 8, kind: input, shape index: {}]   ;;  %s1493_s9 = inlined_call_operand.vmem [shape: bf16[64,32], index: 9, kind: input, shape index: {}]   ;;  %s1494_s10 = inlined_call_operand.vmem [shape: f32[1,32], index: 10, kind: input, shape index: {}]   ;;  %s1495_s11 = inlined_call_operand.vmem [shape: bf16[32,64], index: 11, kind: input, shape index: {}]   ;;  %s1496_s12 = inlined_call_operand.vmem [shape: f32[1,64], index: 12, kind: input, shape index: {}]   ;;  %s1497_s13 = inlined_call_operand.vmem [shape: bf16[64,32], index: 13, kind: input, shape index: {}]   ;;  %s1498_s14 = inlined_call_operand.vmem [shape: f32[1,32], index: 14, kind: input, shape index: {}]   ;;  %s1499_s15 = inlined_call_operand.hbm [shape: f32[2,16,32], index: 15, kind: output, shape index: {}]  }
   0x1   :  { %1508 = sst [smem:[#allocation13_spill]] %s1484_s0 }
   0x2   :  { %1509 = sst [smem:[#allocation14_spill]] %s1485_s1 }
   0x3   :  { %20 = vsyncpa [#allocation4], 0 }
   0x4   :  { %22 = vsyncpa [#allocation4 + $0x1], 0  ;;  %s1297_s18 = smov 0   ;;  %s1299_s19 = smov 0  }
   0x5   :  { %s1301_s20 = smov 0   ;;  %s1303_s21 = smov 0  }
   0x6 LB: > { %1510 = sst [smem:[#allocation6_spill]] %s1201_s18  ;;  %s1318_s22 = sadd.s32 4294967295, %s1213_s21   ;;  %s1213_s21 = sphi %s1303_s21, %s1525_s21   ;;  %s1209_s20 = sphi %s1301_s20, %s1527_s20   ;;  %s1205_s19 = sphi %s1299_s19, %s1529_s19   ;;  %s1201_s18 = sphi %s1297_s18, %s1528_s18  }
   0x7   : > { %1511 = sst [smem:[#allocation7_spill]] %s1209_s20  ;;  %s994_s23 = sadd.s32 4294967294, %s1213_s21  }
   0x8   : > { %1512 = sst [smem:[#allocation8_spill]] %s1213_s21  ;;  %s1322_s24 = sadd.s32 1, %s1213_s21  }
   0x9   : > { %1513 = sst [smem:[#allocation9_spill]] %s1322_s24  ;;  %s365_s25 = sadd.s32 1, %s1209_s20 }
   0xa   : > { %s362_s26 = ssub.s32 %s1213_s21, %s1322_s24  ;;  %p375_p0 = scmp.ne.s32.totalorder %s1209_s20, %s1205_s19 }
   0xb   : > { %p363_p1 = scmp.eq.s32.totalorder %s362_s26, 0  ;;  %p376_p2 = scmp.eq.s32.totalorder %s1318_s22, 1 }
   0xc   : > { %p381_p3 = scmp.ne.s32.totalorder %s1205_s19, %s1201_s18  ;;  %p382_p4 = scmp.eq.s32.totalorder %s994_s23, 1 }
   0xd   : > { %s1333_s27 = scalar_select %p363_p1, %s1209_s20, %s365_s25  }
   0xe   : > { %p1335_p5 = por %p376_p2, %p375_p0  ;;  %p1339_p6 = por %p382_p4, %p381_p3 }
   0xf   : > { %1514 = sst [smem:[#allocation10_spill]] %s1333_s27  ;;  %p997_p7 = scmp.ge.s32.totalorder %s1213_s21, 1 }
  0x10   : > { %s1515_s28 = scalar_select %p1335_p5, 1, 0 }
  0x11   : > { %s1517_s29 = scalar_select %p1339_p6, 1, 0 }
  0x12   : > { %1516 = sst [smem:[#allocation11_spill]] %s1515_s28  ;;  %p458_p8 = scmp.lt.s32.totalorder %s1213_s21, 3 }
  0x13   : > { %1518 = sst [smem:[#allocation12_spill]] %s1517_s29 }
  0x14   : > { %p459_p9 = pnand %p997_p7, %p458_p8 }
  0x15   : > { %p514_p10 = scmp.lt.s32.totalorder (!%p459_p9), %s1318_s22, 1  ;;  %s1519_s0 = sld [smem:[#allocation13_spill]] (!%p459_p9) }
  0x16   : > { %462 = sbr.rel (%p459_p9) target bundleno = 907 (0x38b), region = 80  ;;  %s1520_s1 = sld [smem:[#allocation14_spill]] (!%p459_p9) }
  0x1b   : > { %v1085_v0 = vld [vmem:[%s1488_s4 + $0x18] sm:$0xff]  ;;  %s1350_s17 = scalar_select %p514_p10, %s1318_s22, 1  ;;  %v1084_v1 = vld [vmem:[%s1488_s4 + $0x10] sm:$0xff]  ;;  %v1083_v4 = vld [vmem:[%s1488_s4 + $0x8] sm:$0xff]  ;;  %vm534_vm0 = vcmask 130048   ;;  %vm638_vm1 = vcmask 523264  }
  0x1c   : > { %646 = vmatpush.bf16.msra.mxu3 %v1085_v0  ;;  %v1082_v6 = vld [vmem:[%s1488_s4] sm:$0xff]  ;;  %v533_v7 = vld [vmem:[%s1487_s3 + $0x8] sm:$0xff]  ;;  %vm696_vm2 = vcmask 261120   ;;  %v1091_v20 = vld [vmem:[%s1493_s9 + $0x18] sm:$0xff] }
  0x1d   : > { %s1081_s26 = sshll.u32 %s1350_s17, 4  ;;  %s1001_s27 = sshll.u32 %s1350_s17, 3  ;;  %v532_v8 = vld [vmem:[%s1487_s3] sm:$0xff]  ;;  %572 = vmatpush.msra.mxu1 %v533_v7  ;;  %v1087_v9 = vld [vmem:[%s1491_s7 + $0x8] sm:$0xff]  ;;  %595 = vmatpush.msra.mxu2 %v533_v7  ;;  %v1090_v21 = vld [vmem:[%s1493_s9 + $0x10] sm:$0xff] }
  0x1e   : > { %s518_s29 = scalar_lea.vmem %s1519_s0, %s1081_s26  ;;  %s522_s16 = scalar_lea.vmem %s1520_s1, %s1001_s27  ;;  %v1086_v12 = vld [vmem:[%s1491_s7] sm:$0xff]  ;;  %v1089_v24 = vld [vmem:[%s1493_s9 + $0x8] sm:$0xff]  ;;  %v1097_v57 = vld [vmem:[%s1497_s13 + $0x18] sm:$0xff] }
  0x1f   : > { %v529_v2 = vld [vmem:[%s518_s29 + $0x8] sm:$0xff]  ;;  %v528_v3 = vld [vmem:[%s518_s29] sm:$0xff]  ;;  %573 = vmatpush.msra.mxu1 %v532_v8  ;;  %596 = vmatpush.msra.mxu2 %v532_v8  ;;  %s526_s29 = scalar_lea.vmem %s1486_s2, %s1001_s27  ;;  %v1096_v58 = vld [vmem:[%s1497_s13 + $0x10] sm:$0xff]  ;;  %s511_s26 = sand.u32 1, %s1205_s19  }
  0x20   : > { %647 = vmatpush.bf16.msra.mxu3 %v1084_v1  ;;  %552 = vmatpush.msra.mxu0 %v529_v2  ;;  %v530_v5 = vld [vmem:[%s522_s16] sm:$0xff]  ;;  %v1093_v40 = vld [vmem:[%s1495_s11 + $0x8] sm:$0xff]  ;;  %s998_s30 = sshll.u32 %s511_s26, 4  ;;  %s1098_s16 = sshll.u32 %s1318_s22, 4 }
  0x21   : > { %1004 = vmatmul.msk.f32.vlgmr.msra.gmra.mxu1 %vm534_vm0, %v530_v5  ;;  %v1140_v13 = vld [vmem:[%s1489_s5] ss:$0 sm:$0xff]  ;;  %766 = vmatpush.bf16.msrb.mxu2 %v1091_v20  ;;  %v1095_v59 = vld [vmem:[%s1497_s13 + $0x8] sm:$0xff]  ;;  %s513_s21 = scalar_lea.vmem [#allocation3], %s998_s30  ;;  %s893_s25 = scalar_lea.sflag [#allocation4], %s511_s26 }
  0x22   : > { %553 = vmatpush.msra.mxu0 %v528_v3  ;;  %706 = vmatpush.bf16.msrb.mxu1 %v1087_v9  ;;  %v531_v22 = vld [vmem:[%s526_s29] sm:$0xff]  ;;  %s904_s29 = scalar_lea.hbm %s1499_s15, %s1098_s16  ;;  %s905_s28 = sshll.u32 %s513_s21, 4  ;;  %s906_s28 = int_to_ptr.vmem [resolvable:$true] %s905_s28 }
  0x23   : > { %1003 = vmatmul.msk.f32.vlgmr.msra.gmra.mxu0 %vm534_vm0, %v530_v5  ;;  %1005 = vmatmul.msk.f32.vlgmr.msra.gmra.mxu2 %vm534_vm0, %v531_v22  ;;  %v656_v23 = vld [vmem:[%s1490_s6] sm:$0x1]  ;;  %s907_s23 = sshll.u32 %s904_s29, 4  ;;  %s1171_s16 = scalar_lea.hbm %s1499_s15, 32  ;;  %s908_s23 = int_to_ptr.hbm [resolvable:$true] %s907_s23 }
  0x24   : > { %648 = vmatpush.bf16.msra.mxu3 %v1083_v4  ;;  %664 = vmatpush.bf16.msrb.mxu0 %v1085_v0  ;;  %v1088_v25 = vld [vmem:[%s1493_s9] sm:$0xff]  ;;  %s1165_s22 = sshra.s32 %s908_s23, 4  ;;  %s1166_s22 = int_to_ptr.hbm [resolvable:$true] %s1165_s22 }
  0x25   : > { %767 = vmatpush.bf16.msrb.mxu2 %v1090_v21  ;;  %v1141_v26 = vld [vmem:[%s1492_s8] ss:$0 sm:$0xff]  ;;  %s1167_s27 = scalar_lea.hbm %s1166_s22, 16  ;;  %p1172_p0 = scmp.lt.s32.totalorder %s1166_s22, %s1499_s15 }
  0x26   : > { %707 = vmatpush.bf16.msrb.mxu1 %v1086_v12  ;;  %v609_v41 = vld [vmem:[%s1489_s5] sm:$0x1]  ;;  %p1168_p11 = scmp.ne.s32.totalorder %s1166_s22, %s1167_s27  ;;  %p1173_p1 = scmp.lt.s32.totalorder %s1171_s16, %s1167_s27 }
  0x27   : > { %v1092_v48 = vld [vmem:[%s1495_s11] sm:$0xff] }
  0x28   : > { %665 = vmatpush.bf16.msrb.mxu0 %v1084_v1  ;;  %649 = vmatpush.bf16.msra.mxu3 %v1082_v6  ;;  %v1142_v49 = vld [vmem:[%s1494_s10] ss:$0 sm:$0xff]  ;;  %p1169_p12 = pnand %p1168_p11, %p1335_p5  ;;  %p1174_p2 = por %p1173_p1, %p1172_p0 }
  0x29   : > { %768 = vmatpush.bf16.msrb.mxu2 %v1089_v24  ;;  %v1143_v60 = vld [vmem:[%s1496_s12] ss:$0 sm:$0xff] }
  0x2a   : > { %810 = vmatpush.bf16.msra.mxu1 %v1093_v40  ;;  %v1094_v61 = vld [vmem:[%s1497_s13] sm:$0xff]  ;;  %p1170_p13 = pneg %p1169_p12 }
  0x2b   : > { %v1144_v21 = vld [vmem:[%s1498_s14] ss:$0 sm:$0xff] }
  0x2c   : > { %666 = vmatpush.bf16.msrb.mxu0 %v1083_v4  ;;  %880 = vmatpush.bf16.msrb.mxu3 %v1097_v57  ;;  %p1175_p3 = pnand %p1174_p2, %p1170_p13 }
  0x2d   : > { %769 = vmatpush.bf16.msrb.mxu2 %v1088_v25 }
  0x2e   : > { %811 = vmatpush.bf16.msra.mxu1 %v1092_v48 }
  0x30   : > { %667 = vmatpush.bf16.msrb.mxu0 %v1082_v6  ;;  %881 = vmatpush.bf16.msrb.mxu3 %v1096_v58 }
  0x33   : > { %1023 = vmatmul.msk.bf16.vlgmr.msrb.gmra.mxu0 %vm638_vm1, %v656_v23 }
  0x34   : > { %882 = vmatpush.bf16.msrb.mxu3 %v1095_v59 }
  0x38   : > { %883 = vmatpush.bf16.msrb.mxu3 %v1094_v61 }
  0x9e   : > { %v575_v15 = vpop.f32.mrf.mxu1 }
  0xa0   : > { %v555_v10 = vpop.f32.mrf.mxu0 }
  0xa1   : > { %v610_v11 = vpack.c.bf16 %v555_v10, %v555_v10 }
  0xa3   : > { %1022 = vmatmul.msk.bf16.vlgmr.msra.gmra.mxu3 %vm638_vm1, %v610_v11 }
  0xa6   : > { %v598_v45 = vpop.f32.mrf.mxu2 }
  0xb0   : > { %v669_v42 = vpop.f32.mrf.mxu0 }
  0xb1   : > { %v670_v43 = vadd.f32 %v669_v42, %v609_v41 }
  0xb3   : > { %v673_v44 = vperm.slane %v670_v43, 0 }
  0xb5   : > { %v674_v46 = vadd.f32 %v673_v44, %v598_v45 }
  0xb7   : > { %777 = vst.msk [vmem:[#allocation2 + $0x8] sm:$0xff] %vm696_vm2, %v674_v46 }
  0xb8   : > { %v671_v47 = vpop.f32.mrf.mxu0 }
  0xbe   : > { %v779_v55 = vld [vmem:[#allocation2 + $0x8] sm:$0xff] }
 0x126   : > { %v651_v14 = vpop.f32.mrf.mxu3 }
 0x127   : > { %v652_v16 = vadd.f32 %v1140_v13, %v651_v14 }
 0x129   : > { %v655_v17 = vadd.f32 %v652_v16, %v575_v15 }
 0x12b   : > { %v675_v18 = vpack.c.bf16 %v655_v17, %v655_v17 }
 0x12d   : > { %1032 = vmatmul.msk.bf16.vlgmr.msrb.gmra.mxu1 %vm696_vm2, %v675_v18 }
 0x12e   : > { %v653_v19 = vpop.f32.mrf.mxu3 }
 0x1aa   : > { %v709_v27 = vpop.f32.mrf.mxu1 }
 0x1ab   : > { %v710_v28 = vadd.f32 %v1141_v26, %v709_v27 }
 0x1ad   : > { %v713_v29 = vmul.f32 %v710_v28, %v710_v28 }
 0x1af   : > { %v714_v30 = vmul.f32 %v713_v29, %v710_v28 }
 0x1b1   : > { %v715_v31 = vmul.f32 0.044715, %v714_v30 }
 0x1b2   : > { %v711_v32 = vpop.f32.mrf.mxu1 }
 0x1b3   : > { %v716_v33 = vadd.f32 %v715_v31, %v710_v28 }
 0x1b5   : > { %v717_v34 = vmul.f32 0.7978846, %v716_v33 }
 0x1b7   : > { %1145 = vtanh.f32 %v717_v34 }
 0x1bd   : > { %v1146_v35 = vpop.eup %1145 }
 0x1be   : > { %v719_v36 = vadd.f32 1.0, %v1146_v35 }
 0x1c0   : > { %v720_v37 = vmul.f32 0.5, %v719_v36 }
 0x1c2   : > { %v721_v38 = vmul.f32 %v720_v37, %v710_v28 }
 0x1c4   : > { %v722_v39 = vpack.c.bf16 %v721_v38, %v721_v38 }
 0x1c6   : > { %1049 = vmatmul.msk.bf16.vlgmr.msrb.gmra.mxu2 %vm638_vm1, %v722_v39 }
 0x249   : > { %v771_v50 = vpop.f32.mrf.mxu2 }
 0x24a   : > { %v772_v51 = vadd.f32 %v1142_v49, %v771_v50 }
 0x24c   : > { %v775_v52 = vadd.f32 %v772_v51, %v575_v15 }
 0x24e   : > { %776 = vst.msk [vmem:[#allocation2] sm:$0xff] %vm696_vm2, %v775_v52 }
 0x251   : > { %v773_v53 = vpop.f32.mrf.mxu2 }
 0x255   : > { %v778_v54 = vld [vmem:[#allocation2] sm:$0xff] }
 0x256   : > { %v780_v56 = vpack.c.bf16 %v779_v55, %v778_v54 }
 0x258   : > { %1058 = vmatmul.msk.bf16.vlgmr.msra.gmra.mxu1 %vm696_vm2, %v780_v56 }
 0x2d5   : > { %v813_v62 = vpop.f32.mrf.mxu1 }
 0x2d6   : > { %v814_v63 = vadd.f32 %v1143_v60, %v813_v62 }
 0x2d8   : > { %v818_v0 = vmul.f32 %v814_v63, %v814_v63 }
 0x2da   : > { %v820_v1 = vmul.f32 %v818_v0, %v814_v63 }
 0x2dc   : > { %v822_v2 = vmul.f32 0.044715, %v820_v1 }
 0x2dd   : > { %v815_v3 = vpop.f32.mrf.mxu1 }
 0x2de   : > { %v824_v4 = vadd.f32 %v822_v2, %v814_v63  ;;  %v816_v5 = vadd.f32 %v1143_v60, %v815_v3 }
 0x2e0   : > { %v826_v6 = vmul.f32 0.7978846, %v824_v4  ;;  %v819_v7 = vmul.f32 %v816_v5, %v816_v5 }
 0x2e2   : > { %v821_v8 = vmul.f32 %v819_v7, %v816_v5  ;;  %1147 = vtanh.f32 %v826_v6 }
 0x2e4   : > { %v823_v9 = vmul.f32 0.044715, %v821_v8 }
 0x2e6   : > { %v825_v10 = vadd.f32 %v823_v9, %v816_v5 }
 0x2e8   : > { %v827_v11 = vmul.f32 0.7978846, %v825_v10  ;;  %v1148_v12 = vpop.eup %1147 }
 0x2e9   : > { %v830_v13 = vadd.f32 1.0, %v1148_v12 }
 0x2ea   : > { %1149 = vtanh.f32 %v827_v11 }
 0x2eb   : > { %v832_v15 = vmul.f32 0.5, %v830_v13 }
 0x2ed   : > { %v834_v18 = vmul.f32 %v832_v15, %v814_v63 }
 0x2f0   : > { %v1150_v14 = vpop.eup %1149 }
 0x2f1   : > { %v831_v16 = vadd.f32 1.0, %v1150_v14 }
 0x2f3   : > { %v833_v17 = vmul.f32 0.5, %v831_v16 }
 0x2f5   : > { %v835_v19 = vmul.f32 %v833_v17, %v816_v5 }
 0x2f7   : > { %v836_v20 = vpack.c.bf16 %v835_v19, %v834_v18 }
 0x2f9   : > { %1075 = vmatmul.msk.bf16.vlgmr.msrb.gmra.mxu3 %vm638_vm1, %v836_v20 }
 0x37c   : > { %v885_v22 = vpop.f32.mrf.mxu3 }
 0x37d   : > { %v886_v23 = vadd.f32 %v1144_v21, %v885_v22 }
 0x37f   : > { %890 = vst.msk [vmem:[%s513_s21] sm:$0xff] %vm696_vm2, %v886_v23 }
 0x384   : > { %v887_v24 = vpop.f32.mrf.mxu3 }
 0x385   : > { %v888_v25 = vadd.f32 %v1144_v21, %v887_v24 }
 0x387   : > { %891 = vst.msk [vmem:[%s513_s21 + $0x8] sm:$0xff] %vm696_vm2, %v888_v25 }
 0x388   : > { %1178 = shalt.err (!%p1175_p3)
}
 0x389   : > { %s1215_s26 = smov 128   ;;  %s1216_s29 = smov 8  }
 0x38a   : > { %1099 = dma.vmem_to_hbm [thread:$0]  (%p1335_p5), %s906_s28, 256, %s908_s23, %s893_s25, %s1215_s26, %s1215_s26, %s1216_s29  }
 0x38b PF: > { %s1522_s21 = sld [smem:[#allocation8_spill]] }
 0x38c   : > { %s1523_s0 = sld [smem:[#allocation6_spill]] }
 0x391   : > { %p1105_p4 = scmp.ge.s32.totalorder %s1522_s21, 2 }
 0x392   : > { %s922_s17 = sand.u32 1, %s1523_s0  }
 0x393   : > { %p1102_p7 = pnand %p1105_p4, %p1339_p6  ;;  %s923_s30 = scalar_lea.sflag [#allocation4], %s922_s17 }
 0x395   : > { %p1103_p8 = pneg %p1102_p7 }
 0x397   : > { %1196 = dma.done.wait (%p1103_p8), %s923_s30, 256  }
 0x398   : > { %1198 = vsyncadd (%p1103_p8), %s923_s30, 4294967040  ;;  %s1525_s21 = sld [smem:[#allocation9_spill]]  ;;  %s1528_s18 = smov %s1205_s19 }
 0x399   : > { %s1526_s22 = sld [smem:[#allocation7_spill]] }
 0x39a   : > { %s1527_s20 = sld [smem:[#allocation10_spill]] }
 0x39e   : > { %p25_p9 = scmp.ge.s32.totalorder %s1525_s21, 4  }
 0x39f   : > { %s1529_s19 = smov %s1526_s22 }
 0x3a0   :  { %27 = sbr.rel (!%p25_p9) target bundleno = 6 (0x6), region = 121 }
 0x3a5   :  { %929 = vsyncpa [#allocation4], 1 }
 0x3a6   :  { %931 = vsyncpa [#allocation4 + $0x1], 1 }

</bundles_post_ra>
